<compile_context>
chip_gen: v5e
topology: v5e:2x2
jax: 0.10.0
libtpu: 0.0.40
codegen_flags: <defaults>
</compile_context>

<pallas_src>
import jax
import jax.numpy as jnp
from jax.experimental import pallas as pl
from jax.experimental.pallas import tpu as pltpu

# ----------------------------- model config ---------------------------------
HIDDEN = 128          # stands in for 768
INTERMEDIATE = 256    # stands in for 3072
N_LAYERS = 2
N_HEADS = 4
HEAD_DIM = HIDDEN // N_HEADS
VOCAB = 100
MAX_POS = 64
NUM_LABELS = 2
EMBEDDING_DIM = 256   # wrapper's dialect embedding dim (unused in forward)
LN_EPS = 1e-12


def _round_up(n, m):
    return (n + m - 1) // m * m


def _pick_tm(t, cap=512):
    """Row-tile size: prefer an exact divisor of T (no pad/slice glue) that gives
    >= 2 row blocks (keeps both v7x TensorCores busy via the 'parallel' axis),
    capped at `cap`.  On v7x at real sizes use cap=256 to respect 64 MiB VMEM."""
    target = min(cap, max(8, _round_up(-(-t // 2), 8)))
    tm = target
    while tm > 8 and t % tm != 0:
        tm -= 8
    if t % tm != 0:
        tm = min(cap, _round_up(t, 8))   # fall back to a single padded block
    return tm


# --------------------------- fused Pallas kernel -----------------------------
def _make_ffn_adapter_ln_kernel(tm, hidden, tc, n_chunks):
    """Builds the per-row-tile kernel.  All weights are VMEM-resident full
    blocks; the INTERMEDIATE reduction is a statically-unrolled chunk loop over
    lane-aligned slices of the resident weight refs (zero-cost static views)."""

    def kernel(x_ref, wi_ref, bi_ref, wo_ref, p_ref, bln_ref, o_ref):
        x_f32 = x_ref[...]                          # (tm, H) f32 — exact residual
        x_bf = x_f32.astype(jnp.bfloat16)           # MXU operand

        # inter = gelu(x @ Wi + bi); h += inter @ Wout   (chunked over I)
        acc = jnp.zeros((tm, hidden), jnp.float32)
        for c in range(n_chunks):                   # static unroll (6 at real I)
            lo = c * tc
            inter = jnp.dot(x_bf, wi_ref[:, lo:lo + tc],
                            preferred_element_type=jnp.float32)
            inter = jax.nn.gelu(inter + bi_ref[:, lo:lo + tc], approximate=True)
            acc = acc + jnp.dot(inter.astype(jnp.bfloat16), wo_ref[lo:lo + tc, :],
                                preferred_element_type=jnp.float32)

        bout = bln_ref[0:1, :]
        gamma = bln_ref[1:2, :]
        beta = bln_ref[2:3, :]

        h = acc + bout                              # output.dense result (f32)
        # Adapter: y = h + h @ P.  P kept as its own bf16 operand (values ~1e-7
        # are exactly representable in bf16's exponent range), so the adapter
        # delta survives — unlike folding P into Wout and casting to bf16.
        h = h + jnp.dot(h.astype(jnp.bfloat16), p_ref[...],
                        preferred_element_type=jnp.float32)

        # residual add (f32 x) + LayerNorm epilogue
        y = h + x_f32
        mean = jnp.mean(y, axis=-1, keepdims=True)
        var = jnp.mean(jnp.square(y - mean), axis=-1, keepdims=True)
        yn = (y - mean) * jax.lax.rsqrt(var + LN_EPS)
        o_ref[...] = (yn * gamma + beta).astype(o_ref.dtype)

    return kernel


def fused_ffn_adapter_output(x, wi, bi, wout, bout, adapter_p, gamma, beta,
                             *, tm=None, tc=None):
    """x: (T, H) f32.  Returns LayerNorm(adapter(gelu(x@Wi+bi) @ Wout + bout) + x)
    in f32, where adapter(h) = h + h @ P."""
    T, H = x.shape
    I = wi.shape[1]

    if tm is None:
        tm = _pick_tm(T)
    if tc is None:
        tc = min(I, 512)                 # I-chunk inside the kernel (512 at real I)
        if I % tc != 0:
            tc = I
    n_chunks = I // tc

    t_pad = _round_up(T, tm)
    x_p = x if t_pad == T else jnp.pad(x, ((0, t_pad - T), (0, 0)))

    wi_bf = wi.astype(jnp.bfloat16)
    wo_bf = wout.astype(jnp.bfloat16)
    p_bf = adapter_p.astype(jnp.bfloat16)
    bi_2d = bi.reshape(1, I).astype(jnp.float32)
    bln = jnp.stack([bout, gamma, beta]).astype(jnp.float32)   # (3, H)

    kernel = _make_ffn_adapter_ln_kernel(tm, H, tc, n_chunks)

    grid = (t_pad // tm,)
    out = pl.pallas_call(
        kernel,
        out_shape=jax.ShapeDtypeStruct((t_pad, H), jnp.float32),
        grid=grid,
        in_specs=[
            pl.BlockSpec((tm, H), lambda i: (i, 0)),   # x row tile (f32)
            # Constant index_maps -> fetched from HBM once, VMEM-resident across
            # all row tiles.  (At real sizes add pipeline_mode=pl.Buffered(1)
            # here to halve the weight VMEM footprint on v7x.)
            pl.BlockSpec((H, I), lambda i: (0, 0)),    # Wi      (bf16, resident)
            pl.BlockSpec((1, I), lambda i: (0, 0)),    # bi      (f32,  resident)
            pl.BlockSpec((I, H), lambda i: (0, 0)),    # Wout    (bf16, resident)
            pl.BlockSpec((H, H), lambda i: (0, 0)),    # adapter P (bf16, resident)
            pl.BlockSpec((3, H), lambda i: (0, 0)),    # [bout; gamma; beta]
        ],
        out_specs=pl.BlockSpec((tm, H), lambda i: (i, 0)),
        compiler_params=pltpu.CompilerParams(
            dimension_semantics=("parallel",),
            vmem_limit_bytes=64 * 1024 * 1024,   # v6e/v5e; keep <=~40MB + tm<=256 on v7x
        ),
    )(x_p.astype(jnp.float32), wi_bf, bi_2d, wo_bf, p_bf, bln)
    return out if t_pad == T else out[:T]


def fused_ffn_adapter_output_ref(x, wi, bi, wout, bout, adapter_p, gamma, beta):
    """Pure-JAX reference of the fused block (same bf16 operand casts)."""
    xb = x.astype(jnp.bfloat16)
    inter = jnp.dot(xb, wi.astype(jnp.bfloat16), preferred_element_type=jnp.float32)
    inter = jax.nn.gelu(inter + bi, approximate=True)
    h = jnp.dot(inter.astype(jnp.bfloat16), wout.astype(jnp.bfloat16),
                preferred_element_type=jnp.float32) + bout
    h = h + jnp.dot(h.astype(jnp.bfloat16), adapter_p.astype(jnp.bfloat16),
                    preferred_element_type=jnp.float32)
    y = h + x                                     # f32 residual (matches kernel)
    return layer_norm(y, gamma, beta)


# ------------------------------ plain-JAX glue -------------------------------
def layer_norm(x, g, b, eps=LN_EPS):
    mean = jnp.mean(x, axis=-1, keepdims=True)
    var = jnp.mean(jnp.square(x - mean), axis=-1, keepdims=True)
    return (x - mean) * jax.lax.rsqrt(var + eps) * g + b


def init_params(key):
    def normal(k, shape, std=0.02):
        return std * jax.random.normal(k, shape, dtype=jnp.float32)

    keys = iter(jax.random.split(key, 16 + N_LAYERS * 16))
    params = {
        "word_emb": normal(next(keys), (VOCAB, HIDDEN)),
        "pos_emb": normal(next(keys), (MAX_POS, HIDDEN)),
        "emb_ln_g": jnp.ones((HIDDEN,), jnp.float32),
        "emb_ln_b": jnp.zeros((HIDDEN,), jnp.float32),
        "cls_dense_w": normal(next(keys), (HIDDEN, HIDDEN)),
        "cls_dense_b": jnp.zeros((HIDDEN,), jnp.float32),
        "cls_out_w": normal(next(keys), (HIDDEN, NUM_LABELS)),
        "cls_out_b": jnp.zeros((NUM_LABELS,), jnp.float32),
        "layers": [],
    }
    for _ in range(N_LAYERS):
        lp = {
            "wq": normal(next(keys), (HIDDEN, HIDDEN)),
            "bq": jnp.zeros((HIDDEN,), jnp.float32),
            "wk": normal(next(keys), (HIDDEN, HIDDEN)),
            "bk": jnp.zeros((HIDDEN,), jnp.float32),
            "wv": normal(next(keys), (HIDDEN, HIDDEN)),
            "bv": jnp.zeros((HIDDEN,), jnp.float32),
            "wo": normal(next(keys), (HIDDEN, HIDDEN)),
            "bo": jnp.zeros((HIDDEN,), jnp.float32),
            "attn_ln_g": jnp.ones((HIDDEN,), jnp.float32),
            "attn_ln_b": jnp.zeros((HIDDEN,), jnp.float32),
            "wi": normal(next(keys), (HIDDEN, INTERMEDIATE)),
            "bi": jnp.zeros((INTERMEDIATE,), jnp.float32),
            "wout": normal(next(keys), (INTERMEDIATE, HIDDEN)),
            "bout": jnp.zeros((HIDDEN,), jnp.float32),
            # Adapter param: torch.normal(0, 1e-07, (H, H))
            "adapter_p": 1e-7 * jax.random.normal(next(keys), (HIDDEN, HIDDEN), jnp.float32),
            "out_ln_g": jnp.ones((HIDDEN,), jnp.float32),
            "out_ln_b": jnp.zeros((HIDDEN,), jnp.float32),
        }
        params["layers"].append(lp)
    return params


def task_aware_forward(params, labels, input_ids, attention_mask,
                       dialect_features=None, executed_features=None, **kwargs):
    """Mirrors TaskAwareWrapper.forward: dialect/executed features are accepted
    but unused; the wrapped (adapter-augmented) model is run on
    (labels, input_ids, attention_mask) and returns (loss, logits)."""
    del dialect_features, executed_features, kwargs
    B, S = input_ids.shape

    # embeddings
    x = params["word_emb"][input_ids] + params["pos_emb"][:S][None, :, :]
    x = layer_norm(x, params["emb_ln_g"], params["emb_ln_b"])
    ext_mask = (1.0 - attention_mask.astype(jnp.float32))[:, None, None, :] * -1e9

    for lp in params["layers"]:
        # ------ self-attention (plain-JAX glue, unmodified by the wrapper) ----
        q = x @ lp["wq"] + lp["bq"]
        k = x @ lp["wk"] + lp["bk"]
        v = x @ lp["wv"] + lp["bv"]

        def split(t):
            return t.reshape(B, S, N_HEADS, HEAD_DIM).transpose(0, 2, 1, 3)

        qh, kh, vh = split(q), split(k), split(v)
        scores = jnp.einsum("bhqd,bhkd->bhqk", qh, kh) / jnp.sqrt(float(HEAD_DIM))
        probs = jax.nn.softmax(scores + ext_mask, axis=-1)
        ctx = jnp.einsum("bhqk,bhkd->bhqd", probs, vh)
        ctx = ctx.transpose(0, 2, 1, 3).reshape(B, S, HIDDEN)
        attn_out = ctx @ lp["wo"] + lp["bo"]
        x = layer_norm(attn_out + x, lp["attn_ln_g"], lp["attn_ln_b"])

        # ------ intermediate + output.dense(Adapter) + LN : fused Pallas -----
        x = fused_ffn_adapter_output(
            x.reshape(B * S, HIDDEN),
            lp["wi"], lp["bi"], lp["wout"], lp["bout"], lp["adapter_p"],
            lp["out_ln_g"], lp["out_ln_b"],
        ).reshape(B, S, HIDDEN)

    # classification head (RobertaClassificationHead on <s> token)
    cls = x[:, 0, :]
    h = jnp.tanh(cls @ params["cls_dense_w"] + params["cls_dense_b"])
    logits = h @ params["cls_out_w"] + params["cls_out_b"]

    # cross-entropy loss (labels provided -> model returns loss + logits)
    logp = jax.nn.log_softmax(logits, axis=-1)
    loss = -jnp.mean(jnp.take_along_axis(logp, labels[:, None], axis=1))
    return loss, logits


# ----------------------------------- main ------------------------------------
if __name__ == "__main__":
    key = jax.random.PRNGKey(0)
    k_param, k_ids, k_lab, k_dial, k_exec, k_x = jax.random.split(key, 6)

    params = init_params(k_param)

    B, S = 2, 8
    input_ids = jax.random.randint(k_ids, (B, S), 0, VOCAB, dtype=jnp.int32)
    attention_mask = jnp.ones((B, S), dtype=jnp.int32)
    labels = jax.random.randint(k_lab, (B,), 0, NUM_LABELS, dtype=jnp.int32)
    dialect_features = jax.random.normal(k_dial, (B, EMBEDDING_DIM), jnp.float32)
    executed_features = jax.random.normal(k_exec, (B, EMBEDDING_DIM), jnp.float32)

    # --- unit sanity check: fused Pallas block vs pure-JAX reference ---------
    lp0 = params["layers"][0]
    x_test = jax.random.normal(k_x, (B * S, HIDDEN), jnp.float32)
    got = fused_ffn_adapter_output(
        x_test, lp0["wi"], lp0["bi"], lp0["wout"], lp0["bout"],
        lp0["adapter_p"], lp0["out_ln_g"], lp0["out_ln_b"])
    want = fused_ffn_adapter_output_ref(
        x_test, lp0["wi"], lp0["bi"], lp0["wout"], lp0["bout"],
        lp0["adapter_p"], lp0["out_ln_g"], lp0["out_ln_b"])
    max_err = jnp.max(jnp.abs(got - want))
    jax.block_until_ready(max_err)
    assert float(max_err) < 5e-2, f"fused-block mismatch: {float(max_err)}"

    # --- full wrapper forward -------------------------------------------------
    loss, logits = task_aware_forward(
        params, labels, input_ids, attention_mask,
        dialect_features=dialect_features, executed_features=executed_features,
    )
    jax.block_until_ready((loss, logits))
    assert logits.shape == (B, NUM_LABELS)
    assert bool(jnp.isfinite(loss))
    print("KERNEL_OK")
</pallas_src>

<mosaic_0001>
module attributes {stable_mosaic.version = 11 : i64} {
  func.func @kernel(%arg0: i32, %arg1: memref<8x128xf32, #tpu.memory_space<vmem>>, %arg2: memref<128x256xbf16, #tpu.memory_space<vmem>>, %arg3: memref<1x256xf32, #tpu.memory_space<vmem>>, %arg4: memref<256x128xbf16, #tpu.memory_space<vmem>>, %arg5: memref<128x128xbf16, #tpu.memory_space<vmem>>, %arg6: memref<3x128xf32, #tpu.memory_space<vmem>>, %arg7: memref<8x128xf32, #tpu.memory_space<vmem>>) attributes {dimension_semantics = [#tpu.dimension_semantics<parallel>], iteration_bounds = array<i64: 2>, scalar_prefetch = 0 : i64, scratch_operands = 0 : i64, tpu.core_type = #tpu.core_type<tc>, window_params = [{transform_indices = @transform_0, window_bounds = array<i64: 8, 128>}, {pipeline_mode = #tpu.pipeline_mode<synchronous>, transform_indices = @transform_1, window_bounds = array<i64: 128, 256>}, {pipeline_mode = #tpu.pipeline_mode<synchronous>, transform_indices = @transform_2, window_bounds = array<i64: 1, 256>}, {pipeline_mode = #tpu.pipeline_mode<synchronous>, transform_indices = @transform_3, window_bounds = array<i64: 256, 128>}, {pipeline_mode = #tpu.pipeline_mode<synchronous>, transform_indices = @transform_4, window_bounds = array<i64: 128, 128>}, {pipeline_mode = #tpu.pipeline_mode<synchronous>, transform_indices = @transform_5, window_bounds = array<i64: 3, 128>}, {transform_indices = @transform_6, window_bounds = array<i64: 8, 128>}]} {
    %c0 = arith.constant 0 : index
    %c0_0 = arith.constant 0 : index
    %0 = vector.load %arg1[%c0, %c0_0] : memref<8x128xf32, #tpu.memory_space<vmem>>, vector<8x128xf32>
    %1 = arith.truncf %0 : vector<8x128xf32> to vector<8x128xbf16>
    %cst = arith.constant 0.000000e+00 : f32
    %2 = vector.broadcast %cst : f32 to vector<8x128xf32>
    %c0_1 = arith.constant 0 : index
    %c0_2 = arith.constant 0 : index
    %3 = vector.load %arg2[%c0_1, %c0_2] : memref<128x256xbf16, #tpu.memory_space<vmem>>, vector<128x256xbf16>
    %cst_3 = arith.constant dense<0.000000e+00> : vector<8x256xf32>
    %4 = tpu.matmul %1, %3, %cst_3 {dimension_numbers = #tpu.dot_dimension_numbers<[1], [0], [0], [1], [0, 0, 1, 1], [], []>} : vector<8x128xbf16>, vector<128x256xbf16>, vector<8x256xf32> -> vector<8x256xf32>
    %c0_4 = arith.constant 0 : index
    %c0_5 = arith.constant 0 : index
    %5 = vector.load %arg3[%c0_4, %c0_5] : memref<1x256xf32, #tpu.memory_space<vmem>>, vector<1x256xf32>
    %6 = vector.broadcast %5 : vector<1x256xf32> to vector<8x256xf32>
    %7 = arith.addf %4, %6 : vector<8x256xf32>
    %8 = arith.mulf %7, %7 : vector<8x256xf32>
    %9 = arith.mulf %7, %8 : vector<8x256xf32>
    %cst_6 = arith.constant 4.471500e-02 : f32
    %10 = vector.broadcast %cst_6 : f32 to vector<8x256xf32>
    %11 = arith.mulf %10, %9 : vector<8x256xf32>
    %12 = arith.addf %7, %11 : vector<8x256xf32>
    %cst_7 = arith.constant 0.797884583 : f32
    %13 = vector.broadcast %cst_7 : f32 to vector<8x256xf32>
    %14 = arith.mulf %13, %12 : vector<8x256xf32>
    %15 = math.tanh %14 : vector<8x256xf32>
    %cst_8 = arith.constant 1.000000e+00 : f32
    %16 = vector.broadcast %cst_8 : f32 to vector<8x256xf32>
    %17 = arith.addf %16, %15 : vector<8x256xf32>
    %cst_9 = arith.constant 5.000000e-01 : f32
    %18 = vector.broadcast %cst_9 : f32 to vector<8x256xf32>
    %19 = arith.mulf %18, %17 : vector<8x256xf32>
    %20 = arith.mulf %7, %19 : vector<8x256xf32>
    %21 = arith.truncf %20 : vector<8x256xf32> to vector<8x256xbf16>
    %c0_10 = arith.constant 0 : index
    %c0_11 = arith.constant 0 : index
    %22 = vector.load %arg4[%c0_10, %c0_11] : memref<256x128xbf16, #tpu.memory_space<vmem>>, vector<256x128xbf16>
    %cst_12 = arith.constant dense<0.000000e+00> : vector<8x128xf32>
    %23 = tpu.matmul %21, %22, %cst_12 {dimension_numbers = #tpu.dot_dimension_numbers<[1], [0], [0], [1], [0, 0, 1, 1], [], []>} : vector<8x256xbf16>, vector<256x128xbf16>, vector<8x128xf32> -> vector<8x128xf32>
    %24 = arith.addf %2, %23 : vector<8x128xf32>
    %c0_13 = arith.constant 0 : index
    %c0_14 = arith.constant 0 : index
    %25 = vector.load %arg6[%c0_13, %c0_14] : memref<3x128xf32, #tpu.memory_space<vmem>>, vector<1x128xf32>
    %c1 = arith.constant 1 : index
    %c0_15 = arith.constant 0 : index
    %26 = vector.load %arg6[%c1, %c0_15] : memref<3x128xf32, #tpu.memory_space<vmem>>, vector<1x128xf32>
    %c2 = arith.constant 2 : index
    %c0_16 = arith.constant 0 : index
    %27 = vector.load %arg6[%c2, %c0_16] : memref<3x128xf32, #tpu.memory_space<vmem>>, vector<1x128xf32>
    %28 = vector.broadcast %25 : vector<1x128xf32> to vector<8x128xf32>
    %29 = arith.addf %24, %28 : vector<8x128xf32>
    %30 = arith.truncf %29 : vector<8x128xf32> to vector<8x128xbf16>
    %c0_17 = arith.constant 0 : index
    %c0_18 = arith.constant 0 : index
    %31 = vector.load %arg5[%c0_17, %c0_18] : memref<128x128xbf16, #tpu.memory_space<vmem>>, vector<128x128xbf16>
    %cst_19 = arith.constant dense<0.000000e+00> : vector<8x128xf32>
    %32 = tpu.matmul %30, %31, %cst_19 {dimension_numbers = #tpu.dot_dimension_numbers<[1], [0], [0], [1], [0, 0, 1, 1], [], []>} : vector<8x128xbf16>, vector<128x128xbf16>, vector<8x128xf32> -> vector<8x128xf32>
    %33 = arith.addf %29, %32 : vector<8x128xf32>
    %34 = arith.addf %33, %0 : vector<8x128xf32>
    %cst_20 = arith.constant dense<0.000000e+00> : vector<8xf32>
    %35 = vector.multi_reduction <add>, %34, %cst_20 [1] : vector<8x128xf32> to vector<8xf32>
    %36 = vector.shape_cast %35 : vector<8xf32> to vector<8x1xf32>
    %cst_21 = arith.constant 1.280000e+02 : f32
    %37 = vector.broadcast %cst_21 : f32 to vector<8x1xf32>
    %38 = arith.divf %36, %37 : vector<8x1xf32>
    %39 = vector.broadcast %38 : vector<8x1xf32> to vector<8x128xf32>
    %40 = arith.subf %34, %39 : vector<8x128xf32>
    %41 = arith.mulf %40, %40 : vector<8x128xf32>
    %cst_22 = arith.constant dense<0.000000e+00> : vector<8xf32>
    %42 = vector.multi_reduction <add>, %41, %cst_22 [1] : vector<8x128xf32> to vector<8xf32>
    %43 = vector.shape_cast %42 : vector<8xf32> to vector<8x1xf32>
    %cst_23 = arith.constant 1.280000e+02 : f32
    %44 = vector.broadcast %cst_23 : f32 to vector<8x1xf32>
    %45 = arith.divf %43, %44 : vector<8x1xf32>
    %46 = vector.broadcast %38 : vector<8x1xf32> to vector<8x128xf32>
    %47 = arith.subf %34, %46 : vector<8x128xf32>
    %cst_24 = arith.constant 9.99999996E-13 : f32
    %48 = vector.broadcast %cst_24 : f32 to vector<8x1xf32>
    %49 = arith.addf %45, %48 : vector<8x1xf32>
    %50 = math.rsqrt %49 : vector<8x1xf32>
    %51 = vector.broadcast %50 : vector<8x1xf32> to vector<8x128xf32>
    %52 = arith.mulf %47, %51 : vector<8x128xf32>
    %53 = vector.broadcast %26 : vector<1x128xf32> to vector<8x128xf32>
    %54 = arith.mulf %52, %53 : vector<8x128xf32>
    %55 = vector.broadcast %27 : vector<1x128xf32> to vector<8x128xf32>
    %56 = arith.addf %54, %55 : vector<8x128xf32>
    %c0_25 = arith.constant 0 : index
    %c0_26 = arith.constant 0 : index
    %57 = vector.load %arg7[%c0_25, %c0_26] : memref<8x128xf32, #tpu.memory_space<vmem>>, vector<8x128xf32>
    tpu.vector_store %arg7[%c0_25, %c0_26], %56 {strides = array<i32>} : memref<8x128xf32, #tpu.memory_space<vmem>>, vector<8x128xf32>,
    return
  }
  func.func @transform_0(%arg0: i32) -> (i32, i32) {
    %c0_i32 = arith.constant 0 : i32
    %c0_i32_0 = arith.constant 0 : i32
    return %arg0, %c0_i32 : i32, i32
  }
  func.func @transform_1(%arg0: i32) -> (i32, i32) {
    %c0_i32 = arith.constant 0 : i32
    %c0_i32_0 = arith.constant 0 : i32
    %c0_i32_1 = arith.constant 0 : i32
    return %c0_i32, %c0_i32_0 : i32, i32
  }
  func.func @transform_2(%arg0: i32) -> (i32, i32) {
    %c0_i32 = arith.constant 0 : i32
    %c0_i32_0 = arith.constant 0 : i32
    %c0_i32_1 = arith.constant 0 : i32
    return %c0_i32, %c0_i32_0 : i32, i32
  }
  func.func @transform_3(%arg0: i32) -> (i32, i32) {
    %c0_i32 = arith.constant 0 : i32
    %c0_i32_0 = arith.constant 0 : i32
    %c0_i32_1 = arith.constant 0 : i32
    return %c0_i32, %c0_i32_0 : i32, i32
  }
  func.func @transform_4(%arg0: i32) -> (i32, i32) {
    %c0_i32 = arith.constant 0 : i32
    %c0_i32_0 = arith.constant 0 : i32
    %c0_i32_1 = arith.constant 0 : i32
    return %c0_i32, %c0_i32_0 : i32, i32
  }
  func.func @transform_5(%arg0: i32) -> (i32, i32) {
    %c0_i32 = arith.constant 0 : i32
    %c0_i32_0 = arith.constant 0 : i32
    %c0_i32_1 = arith.constant 0 : i32
    return %c0_i32, %c0_i32_0 : i32, i32
  }
  func.func @transform_6(%arg0: i32) -> (i32, i32) {
    %c0_i32 = arith.constant 0 : i32
    %c0_i32_0 = arith.constant 0 : i32
    return %arg0, %c0_i32 : i32, i32
  }
}

</mosaic_0001>

<bundles_post_ra>
// kernel: tpu_custom_call.1
= control target key start
LH: loop header
LB: loop body
LE: loop exit
PB: predicated region body
PF: predicated region fallthrough
CT: control target
= control target key end

     0   :  { %s1658_s0 = inlined_call_operand.hbm [shape: f32[16,128], index: 0, kind: input, shape index: {}]   ;;  %s1659_s1 = inlined_call_operand.hbm [shape: bf16[128,256], index: 1, kind: input, shape index: {}]   ;;  %s1660_s2 = inlined_call_operand.hbm [shape: f32[1,256], index: 2, kind: input, shape index: {}]   ;;  %s1661_s3 = inlined_call_operand.hbm [shape: bf16[256,128], index: 3, kind: input, shape index: {}]   ;;  %s1662_s4 = inlined_call_operand.hbm [shape: bf16[128,128], index: 4, kind: input, shape index: {}]   ;;  %s1663_s5 = inlined_call_operand.vmem [shape: f32[3,128], index: 5, kind: input, shape index: {}]   ;;  %s1664_s6 = inlined_call_operand.hbm [shape: f32[16,128], index: 6, kind: output, shape index: {}]  }
   0x1   :  { %1665 = sst [smem:[#allocation16_spill]] %s1659_s1 }
   0x2   :  { %11 = vsyncpa [#allocation3], 0 }
   0x3   :  { %13 = vsyncpa [#allocation3 + $0x1], 0 }
   0x4   :  { %14 = vsyncpa [#allocation6], 0 }
   0x5   :  { %15 = vsyncpa [#allocation9], 0 }
   0x6   :  { %16 = vsyncpa [#allocation4], 0 }
   0x7   :  { %18 = vsyncpa [#allocation4 + $0x1], 0  ;;  %s1470_s21 = smov 0   ;;  %s1472_s22 = smov 0  }
   0x8   :  { %s1474_s23 = smov 0   ;;  %s1476_s24 = smov 0  }
   0x9 LB: > { %s1666_s1 = sld [smem:[#allocation16_spill]]  ;;  %s1494_s28 = sadd.s32 4294967295, %s1424_s24   ;;  %s1424_s24 = sphi %s1476_s24, %s1678_s24   ;;  %s1420_s23 = sphi %s1474_s23, %s1677_s23   ;;  %s1416_s22 = sphi %s1472_s22, %s1676_s22   ;;  %s1412_s21 = sphi %s1470_s21, %s1675_s21  }
   0xa   : > { %p878_p0 = scmp.ge.s32.totalorder %s1424_s24, 1  ;;  %p45_p1 = scmp.eq.s32.totalorder %s1494_s28, 0 }
   0xb   : > { %p186_p2 = scmp.lt.s32.totalorder %s1424_s24, 3  ;;  %s1426_s30 = smov [#allocation5]  }
   0xc   : > { %s199_s7 = sshll.u32 %s1426_s30, 4  ;;  %s223_s10 = sshll.u32 %s1661_s3, 4  ;;  %s200_s7 = int_to_ptr.vmem [resolvable:$true] %s199_s7  ;;  %s224_s10 = int_to_ptr.hbm [resolvable:$true] %s223_s10 }
   0xd   : > { %p1499_p3 = pnand %p878_p0, %p186_p2  ;;  %s1427_s12 = smov [#allocation8]  }
   0xe   : > { %s225_s13 = sshll.u32 %s1427_s12, 4  ;;  %s1428_s14 = smov 128   ;;  %s226_s13 = int_to_ptr.vmem [resolvable:$true] %s225_s13 }
   0xf   : > { %s197_s27 = sshll.u32 %s1666_s1, 4  ;;  %p1117_p4 = pneg %p1499_p3  ;;  %s198_s27 = int_to_ptr.hbm [resolvable:$true] %s197_s27 }
  0x10   : > { %s1429_s15 = smov 8   ;;  %s1430_s16 = smov 64  }
  0x11   : > { %p1511_p6 = pnand %p1117_p4, %p45_p1  ;;  %s1431_s17 = smov 4  }
  0x12   : > { %s212_s20 = sshll.u32 %s1660_s2, 4  ;;  %s1432_s25 = smov [#allocation7]   ;;  %s213_s20 = int_to_ptr.hbm [resolvable:$true] %s212_s20 }
  0x13   : > { %1120 = dma.hbm_to_vmem [thread:$0]  (!%p1511_p6), %s198_s27, 2048, %s200_s7, [#allocation6], %s1428_s14, %s1428_s14, %s1429_s15  }
  0x14   : > { %1126 = dma.hbm_to_vmem [thread:$0]  (!%p1511_p6), %s224_s10, 2048, %s226_s13, [#allocation9], %s1430_s16, %s1430_s16, %s1431_s17  }
  0x15   : > { %s214_s26 = sshll.u32 %s1432_s25, 4  ;;  %s237_s7 = sshll.u32 %s1662_s4, 4  ;;  %s215_s26 = int_to_ptr.vmem [resolvable:$true] %s214_s26  ;;  %s238_s7 = int_to_ptr.hbm [resolvable:$true] %s237_s7 }
  0x16   : > { %1123 = dma.hbm_to_vmem [thread:$0]  (!%p1511_p6), %s213_s20, 32, %s215_s26, [#allocation6]  }
  0x17   : > { %s1433_s8 = smov [#allocation10]   ;;  %s877_s10 = sadd.s32 4294967294, %s1424_s24  }
  0x18   : > { %s239_s9 = sshll.u32 %s1433_s8, 4  ;;  %s1531_s12 = sadd.s32 1, %s1424_s24   ;;  %s240_s9 = int_to_ptr.vmem [resolvable:$true] %s239_s9 }
  0x19   : > { %1129 = dma.hbm_to_vmem [thread:$0]  (!%p1511_p6), %s238_s7, 1024, %s240_s9, [#allocation9], %s1430_s16, %s1430_s16, %s1431_s17  }
  0x1a   : > { %s28_s13 = ssub.s32 %s1424_s24, %s1531_s12  ;;  %s31_s14 = sadd.s32 1, %s1420_s23 }
  0x1b   : > { %p29_p7 = scmp.eq.s32.totalorder %s28_s13, 0  ;;  %p38_p8 = scmp.ne.s32.totalorder %s1420_s23, %s1416_s22 }
  0x1c   : > { %p39_p9 = scmp.eq.s32.totalorder %s1424_s24, 0  ;;  %p44_p10 = scmp.ne.s32.totalorder %s1416_s22, %s1412_s21 }
  0x1d   : > { %s1542_s15 = scalar_select %p29_p7, %s1420_s23, %s31_s14  }
  0x1e   : > { %p1544_p11 = por %p39_p9, %p38_p8  ;;  %p1550_p12 = por %p45_p1, %p44_p10 }
  0x1f   : > { %p173_p13 = scmp.eq.s32.totalorder %s1494_s28, 1  ;;  %p179_p0 = scmp.eq.s32.totalorder %s877_s10, 1 }
  0x20   : > { %p1142_p2 = scmp.lt.s32.totalorder %s1424_s24, 2  ;;  %s256_s16 = sand.u32 1, %s1420_s23  }
  0x21   : > { %p1557_p4 = por %p173_p13, %p38_p8  ;;  %p1561_p6 = por %p179_p0, %p44_p10 }
  0x22   : > { %s884_s20 = sshll.u32 %s256_s16, 3  ;;  %s885_s25 = sshll.u32 %s1424_s24, 3 }
  0x23   : > { %s264_s30 = scalar_lea.hbm %s1658_s0, %s885_s25  ;;  %s260_s7 = scalar_lea.vmem [#allocation2], %s884_s20 }
  0x24   : > { %s268_s8 = sshll.u32 %s260_s7, 4  ;;  %s266_s9 = sshll.u32 %s264_s30, 4  ;;  %s269_s8 = int_to_ptr.vmem [resolvable:$true] %s268_s8  ;;  %s267_s9 = int_to_ptr.hbm [resolvable:$true] %s266_s9 }
  0x25   : > { %p1571_p7 = pnand %p1142_p2, %p1544_p11  ;;  %s257_s13 = scalar_lea.sflag [#allocation3], %s256_s16 }
  0x26   : > { %s1320_s14 = sshra.s32 %s267_s9, 4  ;;  %s1327_s26 = scalar_lea.hbm %s1658_s0, 16  ;;  %s1321_s14 = int_to_ptr.hbm [resolvable:$true] %s1320_s14 }
  0x27   : > { %s1322_s1 = scalar_lea.hbm %s1321_s14, 8  ;;  %p1324_p9 = pneg %p1571_p7 }
  0x28   : > { %p1323_p8 = scmp.ne.s32.totalorder %s1321_s14, %s1322_s1  ;;  %p1328_p11 = scmp.lt.s32.totalorder %s1321_s14, %s1658_s0 }
  0x29   : > { %p1329_p0 = scmp.lt.s32.totalorder %s1327_s26, %s1322_s1 }
  0x2a   : > { %p1325_p10 = pnand %p1324_p9, %p1323_p8 }
  0x2b   : > { %p1330_p2 = por %p1329_p0, %p1328_p11 }
  0x2c   : > { %p1326_p13 = pneg %p1325_p10 }
  0x2e   : > { %p1331_p5 = pnand %p1330_p2, %p1326_p13 }
  0x30   : > { %1334 = shalt.err (!%p1331_p5)
}
  0x31   : > { %1133 = dma.hbm_to_vmem [thread:$0]  (!%p1571_p7), %s267_s9, 128, %s269_s8, %s257_s13  }
  0x32   : > { %277 = sbr.rel (%p1499_p3) target bundleno = 784 (0x310), region = 44  ;;  %s1588_s16 = sand.u32 (!%p1499_p3), 1, %s1416_s22  }
  0x33   : > { %s887_s30 = sshll.u32 (!%p1499_p3), %s1588_s16, 3  ;;  %s280_s7 = scalar_lea.sflag (!%p1499_p3), [#allocation3], %s1588_s16 }
  0x34   : > { %s1594_s1 = scalar_lea.vmem (!%p1499_p3), [#allocation2], %s887_s30 }
  0x37   : > { %1395 = dma.done.wait (%p1550_p12), %s280_s7, 128  }
  0x38   : > { %1397 = vsyncadd (%p1550_p12), %s280_s7, 4294967168 }
  0x39   : > { %1399 = dma.done.wait (%p45_p1), [#allocation6], 2080  }
  0x3a   : > { %1401 = vsyncadd (%p45_p1), [#allocation6], 4294965216 }
  0x3b   : > { %1403 = dma.done.wait (%p45_p1), [#allocation9], 3072  }
  0x3c   : > { %1405 = vsyncadd (%p45_p1), [#allocation9], 4294964224  ;;  %v951_v0 = vld [vmem:[#allocation5 + $0x70] sm:$0xf]  ;;  %v1072_v1 = vld [vmem:[#allocation5 + $0x74] sm:$0xf0] }
  0x3d   : > { %v1071_v2 = vld [vmem:[#allocation5 + $0x74] sm:$0xf]  ;;  %v952_v3 = vor.u32 %v1072_v1, %v951_v0  ;;  %v953_v4 = vld [vmem:[#allocation5 + $0x78] sm:$0xf0]  ;;  %v943_v5 = vld [vmem:[#allocation5 + $0x60] sm:$0xf] }
  0x3e   : > { %v1070_v6 = vld [vmem:[#allocation5 + $0x64] sm:$0xf0]  ;;  %v956_v7 = vor.u32 %v1071_v2, %v953_v4  ;;  %v1069_v8 = vld [vmem:[#allocation5 + $0x64] sm:$0xf]  ;;  %v945_v9 = vld [vmem:[#allocation5 + $0x68] sm:$0xf0] }
  0x3f   : > { %437 = vmatpush.bf16.msra.mxu0 %v952_v3  ;;  %v944_v10 = vor.u32 %v1070_v6, %v943_v5  ;;  %v948_v11 = vor.u32 %v1069_v8, %v945_v9  ;;  %v935_v12 = vld [vmem:[#allocation5 + $0x50] sm:$0xf]  ;;  %v1068_v13 = vld [vmem:[#allocation5 + $0x54] sm:$0xf0]  ;;  %v1067_v14 = vld [vmem:[#allocation5 + $0x54] sm:$0xf] }
  0x40   : > { %450 = vmatpush.bf16.msra.mxu1 %v956_v7  ;;  %v937_v15 = vld [vmem:[#allocation5 + $0x58] sm:$0xf0]  ;;  %v936_v16 = vor.u32 %v1068_v13, %v935_v12  ;;  %v927_v18 = vld [vmem:[#allocation5 + $0x40] sm:$0xf]  ;;  %v1066_v19 = vld [vmem:[#allocation5 + $0x44] sm:$0xf0] }
  0x41   : > { %v940_v17 = vor.u32 %v1067_v14, %v937_v15  ;;  %v1065_v20 = vld [vmem:[#allocation5 + $0x44] sm:$0xf]  ;;  %v929_v21 = vld [vmem:[#allocation5 + $0x48] sm:$0xf0]  ;;  %v928_v22 = vor.u32 %v1066_v19, %v927_v18  ;;  %v919_v23 = vld [vmem:[#allocation5 + $0x30] sm:$0xf] }
  0x42   : > { %v1080_v24 = vld [vmem:[#allocation8 + $0x38] sm:$0xff]  ;;  %v932_v26 = vor.u32 %v1065_v20, %v929_v21  ;;  %v1063_v28 = vld [vmem:[#allocation5 + $0x34] sm:$0xf]  ;;  %v1062_v33 = vld [vmem:[#allocation5 + $0x24] sm:$0xf0]  ;;  %s1054_s8 = sshll.u32 %s1494_s28, 3 }
  0x43   : > { %438 = vmatpush.bf16.msra.mxu0 %v944_v10  ;;  %v1088_v25 = vld [vmem:[#allocation8 + $0x78] sm:$0xff]  ;;  %615 = vmatpush.bf16.msra.mxu2 %v1080_v24  ;;  %v1061_v34 = vld [vmem:[#allocation5 + $0x24] sm:$0xf]  ;;  %v913_v35 = vld [vmem:[#allocation5 + $0x28] sm:$0xf0]  ;;  %s764_s20 = scalar_lea.hbm %s1664_s6, %s1054_s8  ;;  %s332_s28 = scalar_lea.vmem [#allocation11], %s887_s30 }
  0x44   : > { %451 = vmatpush.bf16.msra.mxu1 %v948_v11  ;;  %v1064_v27 = vld [vmem:[#allocation5 + $0x34] sm:$0xf0]  ;;  %v921_v29 = vld [vmem:[#allocation5 + $0x38] sm:$0xf0]  ;;  %628 = vmatpush.bf16.msra.mxu3 %v1088_v25  ;;  %v911_v32 = vld [vmem:[#allocation5 + $0x20] sm:$0xf]  ;;  %v916_v37 = vor.u32 %v1061_v34, %v913_v35 }
  0x45   : > { %v920_v30 = vor.u32 %v1064_v27, %v919_v23  ;;  %v924_v31 = vor.u32 %v1063_v28, %v921_v29  ;;  %v912_v36 = vor.u32 %v1062_v33, %v911_v32  ;;  %v903_v38 = vld [vmem:[#allocation5 + $0x10] sm:$0xf]  ;;  %v1060_v39 = vld [vmem:[#allocation5 + $0x14] sm:$0xf0]  ;;  %v1059_v40 = vld [vmem:[#allocation5 + $0x14] sm:$0xf] }
  0x46   : > { %v905_v41 = vld [vmem:[#allocation5 + $0x18] sm:$0xf0]  ;;  %v904_v42 = vor.u32 %v1060_v39, %v903_v38  ;;  %v895_v44 = vld [vmem:[#allocation5] sm:$0xf]  ;;  %v1058_v45 = vld [vmem:[#allocation5 + $0x4] sm:$0xf0] }
  0x47   : > { %439 = vmatpush.bf16.msra.mxu0 %v936_v16  ;;  %v908_v43 = vor.u32 %v1059_v40, %v905_v41  ;;  %v1057_v46 = vld [vmem:[#allocation5 + $0x4] sm:$0xf]  ;;  %v897_v47 = vld [vmem:[#allocation5 + $0x8] sm:$0xf0]  ;;  %v896_v48 = vor.u32 %v1058_v45, %v895_v44  ;;  %v1609_v49 = vld [vmem:[%s1594_s1] sm:$0xff]  ;;  %s766_s27 = sshll.u32 %s332_s28, 4  ;;  %s767_s27 = int_to_ptr.vmem [resolvable:$true] %s766_s27 }
  0x48   : > { %452 = vmatpush.bf16.msra.mxu1 %v940_v17  ;;  %v900_v50 = vor.u32 %v1057_v46, %v897_v47  ;;  %v334_v51 = vpack.c.bf16 %v1609_v49, %v1609_v49  ;;  %v1079_v52 = vld [vmem:[#allocation8 + $0x30] sm:$0xff]  ;;  %v1078_v54 = vld [vmem:[#allocation8 + $0x28] sm:$0xff]  ;;  %v1077_v56 = vld [vmem:[#allocation8 + $0x20] sm:$0xff]  ;;  %s768_s18 = sshll.u32 %s764_s20, 4  ;;  %s754_s7 = scalar_lea.sflag [#allocation4], %s1588_s16  ;;  %s769_s18 = int_to_ptr.hbm [resolvable:$true] %s768_s18 }
  0x49   : > { %v1087_v53 = vld [vmem:[#allocation8 + $0x70] sm:$0xff]  ;;  %616 = vmatpush.bf16.msra.mxu2 %v1079_v52  ;;  %v1086_v55 = vld [vmem:[#allocation8 + $0x68] sm:$0xff]  ;;  %v1085_v57 = vld [vmem:[#allocation8 + $0x60] sm:$0xff]  ;;  %v1434_v52 = vmov 128.0   ;;  %s1364_s1 = sshra.s32 %s769_s18, 4  ;;  %s1370_s9 = scalar_lea.hbm %s1664_s6, 16  ;;  %s1365_s1 = int_to_ptr.hbm [resolvable:$true] %s1364_s1 }
  0x4a   : > { %629 = vmatpush.bf16.msra.mxu3 %v1087_v53  ;;  %v1076_v58 = vld [vmem:[#allocation8 + $0x18] sm:$0xff]  ;;  %v1075_v60 = vld [vmem:[#allocation8 + $0x10] sm:$0xff]  ;;  %v1074_v62 = vld [vmem:[#allocation8 + $0x8] sm:$0xff]  ;;  %s1366_s29 = scalar_lea.hbm %s1365_s1, 8  ;;  %p1371_p12 = scmp.lt.s32.totalorder %s1365_s1, %s1664_s6 }
  0x4b   : > { %440 = vmatpush.bf16.msra.mxu0 %v928_v22  ;;  %v1084_v59 = vld [vmem:[#allocation8 + $0x58] sm:$0xff]  ;;  %v1083_v61 = vld [vmem:[#allocation8 + $0x50] sm:$0xff]  ;;  %v1082_v63 = vld [vmem:[#allocation8 + $0x48] sm:$0xff]  ;;  %p1367_p1 = scmp.ne.s32.totalorder %s1365_s1, %s1366_s29  ;;  %p1372_p7 = scmp.lt.s32.totalorder %s1370_s9, %s1366_s29 }
  0x4c   : > { %453 = vmatpush.bf16.msra.mxu1 %v932_v26  ;;  %v1073_v0 = vld [vmem:[#allocation8] sm:$0xff]  ;;  %v351_v2 = vld [vmem:[#allocation7] sm:$0x3]  ;;  %v1095_v6 = vld [vmem:[#allocation10 + $0x30] sm:$0xff] }
  0x4d   : > { %617 = vmatpush.bf16.msra.mxu2 %v1078_v54  ;;  %v1081_v1 = vld [vmem:[#allocation8 + $0x40] sm:$0xff]  ;;  %v353_v3 = vperm.slane %v351_v2, 0  ;;  %v1096_v4 = vld [vmem:[#allocation10 + $0x38] sm:$0xff]  ;;  %v354_v5 = vperm.slane %v351_v2, 1  ;;  %v1094_v12 = vld [vmem:[#allocation10 + $0x28] sm:$0xff]  ;;  %p1368_p3 = pnand %p1367_p1, %p1557_p4  ;;  %p1373_p8 = por %p1372_p7, %p1371_p12 }
  0x4e   : > { %630 = vmatpush.bf16.msra.mxu3 %v1086_v55  ;;  %v1093_v17 = vld [vmem:[#allocation10 + $0x20] sm:$0xff]  ;;  %v1092_v24 = vld [vmem:[#allocation10 + $0x18] sm:$0xff]  ;;  %v1091_v26 = vld [vmem:[#allocation10 + $0x10] sm:$0xff] }
  0x4f   : > { %441 = vmatpush.bf16.msra.mxu0 %v920_v30  ;;  %v1089_v38 = vld [vmem:[#allocation10] sm:$0xff]  ;;  %v1189_v39 = vld [vmem:[%s1663_s5] ss:$0 sm:$0xff]  ;;  %p1369_p5 = pneg %p1368_p3 }
  0x50   : > { %454 = vmatpush.bf16.msra.mxu1 %v924_v31 }
  0x51   : > { %618 = vmatpush.bf16.msra.mxu2 %v1077_v56  ;;  %p1374_p9 = pnand %p1373_p8, %p1369_p5 }
  0x52   : > { %631 = vmatpush.bf16.msra.mxu3 %v1085_v57 }
  0x53   : > { %442 = vmatpush.bf16.msra.mxu0 %v912_v36 }
  0x54   : > { %455 = vmatpush.bf16.msra.mxu1 %v916_v37  ;;  %v1090_v37 = vld [vmem:[#allocation10 + $0x8] sm:$0xff] }
  0x55   : > { %619 = vmatpush.bf16.msra.mxu2 %v1076_v58 }
  0x56   : > { %632 = vmatpush.bf16.msra.mxu3 %v1084_v59 }
  0x57   : > { %443 = vmatpush.bf16.msra.mxu0 %v904_v42 }
  0x58   : > { %456 = vmatpush.bf16.msra.mxu1 %v908_v43 }
  0x59   : > { %620 = vmatpush.bf16.msra.mxu2 %v1075_v60 }
  0x5a   : > { %633 = vmatpush.bf16.msra.mxu3 %v1083_v61 }
  0x5b   : > { %444 = vmatpush.bf16.msra.mxu0 %v896_v48 }
  0x5c   : > { %457 = vmatpush.bf16.msra.mxu1 %v900_v50 }
  0x5d   : > { %621 = vmatpush.bf16.msra.mxu2 %v1074_v62 }
  0x5e   : > { %445 = vmatmul.bf16.vlgmr.msra.gmra.mxu0 %v334_v51  ;;  %634 = vmatpush.bf16.msra.mxu3 %v1082_v63 }
  0x5f   : > { %458 = vmatmul.bf16.vlgmr.msra.gmra.mxu1 %v334_v51  ;;  %706 = vmatpush.bf16.msrb.mxu0 %v1096_v4 }
  0x61   : > { %622 = vmatpush.bf16.msra.mxu2 %v1073_v0 }
  0x62   : > { %635 = vmatpush.bf16.msra.mxu3 %v1081_v1 }
  0x63   : > { %707 = vmatpush.bf16.msrb.mxu0 %v1095_v6 }
  0x67   : > { %708 = vmatpush.bf16.msrb.mxu0 %v1094_v12 }
  0x6b   : > { %709 = vmatpush.bf16.msrb.mxu0 %v1093_v17 }
  0x6f   : > { %710 = vmatpush.bf16.msrb.mxu0 %v1092_v24 }
  0x73   : > { %711 = vmatpush.bf16.msrb.mxu0 %v1091_v26 }
  0x77   : > { %712 = vmatpush.bf16.msrb.mxu0 %v1090_v37 }
  0x7b   : > { %713 = vmatpush.bf16.msrb.mxu0 %v1089_v38 }
  0xdb   : > { %v446_v7 = vpop.f32.mrf.mxu0 }
  0xdc   : > { %v447_v8 = vadd.f32 %v446_v7, %v353_v3  ;;  %v459_v9 = vpop.f32.mrf.mxu1  ;;  %v1190_v7 = vld [vmem:[%s1663_s5 + $0x1] ss:$0 sm:$0xff] }
  0xdd   : > { %v460_v10 = vadd.f32 %v459_v9, %v354_v5 }
  0xde   : > { %v463_v11 = vmul.f32 %v447_v8, %v447_v8 }
  0xdf   : > { %v464_v13 = vmul.f32 %v460_v10, %v460_v10 }
  0xe0   : > { %v465_v14 = vmul.f32 %v463_v11, %v447_v8 }
  0xe1   : > { %v466_v15 = vmul.f32 %v464_v13, %v460_v10 }
  0xe2   : > { %v467_v16 = vmul.f32 0.044715, %v465_v14 }
  0xe3   : > { %v468_v18 = vmul.f32 0.044715, %v466_v15  ;;  %v448_v19 = vpop.f32.mrf.mxu0 }
  0xe4   : > { %v461_v20 = vpop.f32.mrf.mxu1  ;;  %v469_v21 = vadd.f32 %v467_v16, %v447_v8 }
  0xe5   : > { %v470_v22 = vadd.f32 %v468_v18, %v460_v10 }
  0xe6   : > { %v471_v23 = vmul.f32 0.7978846, %v469_v21 }
  0xe7   : > { %v472_v25 = vmul.f32 0.7978846, %v470_v22 }
  0xe8   : > { %1192 = vtanh.f32 %v471_v23 }
  0xe9   : > { %1194 = vtanh.f32 %v472_v25 }
  0xea   : > { %1196 = vrcp.f32 %v1434_v52 }
  0xee   : > { %v1193_v27 = vpop.eup %1192 }
  0xef   : > { %v1195_v28 = vpop.eup %1194  ;;  %v475_v29 = vadd.f32 1.0, %v1193_v27 }
  0xf0   : > { %v476_v30 = vadd.f32 1.0, %v1195_v28  ;;  %v1197_v53 = vpop.eup %1196 }
  0xf1   : > { %v477_v31 = vmul.f32 0.5, %v475_v29  ;;  %v724_v54 = vmul.f32 128.0, %v1197_v53  ;;  %vm728_vm0 = vweird.f32 %v1197_v53 }
  0xf2   : > { %v478_v32 = vmul.f32 0.5, %v476_v30 }
  0xf3   : > { %v479_v33 = vmul.f32 %v477_v31, %v447_v8  ;;  %v725_v55 = vsub.f32 1.0, %v724_v54 }
  0xf4   : > { %v480_v34 = vmul.f32 %v478_v32, %v460_v10  ;;  %v1191_v10 = vld [vmem:[%s1663_s5 + $0x2] ss:$0 sm:$0xff] }
  0xf5   : > { %v481_v35 = vpack.c.bf16 %v479_v33, %v479_v33  ;;  %v726_v56 = vmul.f32 %v1197_v53, %v725_v55 }
  0xf6   : > { %v482_v36 = vpack.c.bf16 %v480_v34, %v480_v34 }
  0xf7   : > { %623 = vmatmul.bf16.vlgmr.msra.gmra.mxu2 %v481_v35  ;;  %v727_v57 = vadd.f32 %v1197_v53, %v726_v56 }
  0xf8   : > { %636 = vmatmul.bf16.vlgmr.msra.gmra.mxu3 %v482_v36 }
  0xf9   : > { %v729_v58 = vsel %vm728_vm0, %v1197_v53, %v727_v57 }
 0x17a   : > { %v624_v40 = vpop.f32.mrf.mxu2 }
 0x17b   : > { %v625_v41 = vadd.f32 %v1189_v39, %v624_v40  ;;  %v637_v42 = vpop.f32.mrf.mxu3 }
 0x17d   : > { %v638_v43 = vadd.f32 %v637_v42, %v625_v41 }
 0x17f   : > { %v641_v44 = vpack.c.bf16 %v638_v43, %v638_v43 }
 0x181   : > { %714 = vmatmul.bf16.vlgmr.msrb.gmra.mxu0 %v641_v44 }
 0x182   : > { %v626_v45 = vpop.f32.mrf.mxu2 }
 0x183   : > { %v639_v46 = vpop.f32.mrf.mxu3 }
 0x1fe   : > { %v715_v47 = vpop.f32.mrf.mxu0 }
 0x1ff   : > { %v719_v48 = vadd.f32 %v715_v47, %v638_v43 }
 0x201   : > { %v720_v50 = vadd.f32 %v719_v48, %v1609_v49 }
 0x203   : > { %721 = vadd.xlane.f32.xlu0 %v720_v50 }
 0x206   : > { %v717_v51 = vpop.f32.mrf.mxu0 }
 0x276   : > { %v722_v59 = vpop.xlane.xlu0 %721 }
 0x277   : > { %v730_v60 = vmul.f32 %v729_v58, %v722_v59 }
 0x279   : > { %v731_v61 = vsub.f32 %v720_v50, %v730_v60 }
 0x27b   : > { %v732_v62 = vmul.f32 %v731_v61, %v731_v61 }
 0x27d   : > { %733 = vadd.xlane.f32.xlu0 %v732_v62 }
 0x2f0   : > { %v734_v63 = vpop.xlane.xlu0 %733 }
 0x2f1   : > { %v735_v0 = vmul.f32 %v734_v63, %v729_v58 }
 0x2f3   : > { %v736_v49 = vadd.f32 1e-12, %v735_v0 }
 0x2f5   : > { %1198 = vrsqrt.f32 %v736_v49  ;;  %vm743_vm2 = vweird.f32 %v736_v49 }
 0x2fb   : > { %v1199_v1 = vpop.eup %1198 }
 0x2fc   : > { %v738_v2 = vmul.f32 %v1199_v1, %v736_v49  ;;  %vm744_vm1 = vweird.f32 %v1199_v1 }
 0x2fd   : > { %vm745_vm3 = vmor %vm743_vm2, %vm744_vm1 }
 0x2fe   : > { %v739_v3 = vmul.f32 %v1199_v1, %v738_v2 }
 0x300   : > { %v740_v4 = vmul.f32 0.5, %v739_v3 }
 0x302   : > { %v741_v5 = vsub.f32 1.5, %v740_v4 }
 0x304   : > { %v742_v6 = vmul.f32 %v1199_v1, %v741_v5 }
 0x306   : > { %v746_v8 = vsel %vm745_vm3, %v1199_v1, %v742_v6 }
 0x307   : > { %v747_v9 = vmul.f32 %v746_v8, %v731_v61 }
 0x309   : > { %v749_v11 = vmul.f32 %v1190_v7, %v747_v9 }
 0x30b   : > { %v751_v12 = vadd.f32 %v1191_v10, %v749_v11 }
 0x30d   : > { %752 = vst [vmem:[%s332_s28] sm:$0xff] %v751_v12 }
 0x30e   : > { %1377 = shalt.err (!%p1374_p9)
}
 0x30f   : > { %1115 = dma.vmem_to_hbm [thread:$0]  (%p1557_p4), %s767_s27, 128, %s769_s18, %s754_s7  }
 0x310 PF: > { %s780_s16 = sand.u32 1, %s1412_s21   ;;  %p1674_p10 = scmp.ge.s32.totalorder %s1424_s24, 2 }
 0x311   : > { %s781_s13 = scalar_lea.sflag [#allocation4], %s780_s16 }
 0x312   : > { %p1135_p13 = pnand %p1674_p10, %p1561_p6 }
 0x314   : > { %p1136_p11 = pneg %p1135_p13 }
 0x316   : > { %1407 = dma.done.wait (%p1136_p11), %s781_s13, 128  }
 0x317   : > { %1409 = vsyncadd (%p1136_p11), %s781_s13, 4294967168  ;;  %p21_p0 = scmp.ge.s32.totalorder %s1531_s12, 4   ;;  %s1675_s21 = smov %s1416_s22 }
 0x318   : > { %s1676_s22 = smov %s1420_s23  ;;  %s1677_s23 = smov %s1542_s15 }
 0x319   : > { %s1678_s24 = smov %s1531_s12  ;;  %23 = sbr.rel (!%p21_p0) target bundleno = 9 (0x9), region = 105 }
 0x31e   :  { %787 = vsyncpa [#allocation3], 1 }
 0x31f   :  { %789 = vsyncpa [#allocation3 + $0x1], 1 }
 0x320   :  { %790 = vsyncpa [#allocation6], 1 }
 0x321   :  { %791 = vsyncpa [#allocation9], 1 }
 0x322   :  { %792 = vsyncpa [#allocation4], 1 }
 0x323   :  { %794 = vsyncpa [#allocation4 + $0x1], 1 }

</bundles_post_ra>
